<compile_context>
chip_gen: v7x
topology: tpu7x:2x2x1
jax: 0.10.0
libtpu: 0.0.40
codegen_flags: <defaults>
</compile_context>

<pallas_src>
import jax
import jax.numpy as jnp
from jax.experimental import pallas as pl
from jax.experimental.pallas import tpu as pltpu

EPS = 1e-6
SMOOTH_EPS = 1e-16

SUBSPACES = (1, 3, 3, 1)          # grade sizes for Cl(3,0)
N_SUBSPACES = len(SUBSPACES)      # 4
DIM = sum(SUBSPACES)              # 8 = 2**3


def _norm_kernel(x_ref, gate_ref, o_ref):
    # x_ref: (TR, TC) lane-dense multivector tile (TC % 8 == 0)
    # gate_ref: (2, TC): row 0 = w = sigmoid(a) repeated over blades, row 1 = 1+EPS-w
    x = x_ref[...].astype(jnp.float32)
    tc = x.shape[-1]

    gate = gate_ref[...]
    w = gate[0:1, :]
    b = gate[1:2, :]

    # lane-class masks (computed once per tile on a (1, tc) row, broadcast over rows)
    lane = jax.lax.broadcasted_iota(jnp.int32, (1, tc), 1)
    m = lane & 7
    is_scalar = jnp.logical_or(m == 0, m == 7)   # size-1 grades: q = x^2
    is_first = jnp.logical_or(m == 1, m == 4)    # 1st component of a size-3 grade

    x2 = x * x
    # u[l] = x2[l] + x2[l+1] + x2[l+2]  (valid exactly on the first lane of a 3-group)
    u = (x2 + pltpu.roll(x2, shift=tc - 1, axis=1)) + pltpu.roll(x2, shift=tc - 2, axis=1)
    # Park the 3-group sum on its first lane (exact zero elsewhere — padding-safe),
    # then broadcast it onto all 3 lanes of the group with two small rolls.
    c = jnp.where(is_first, u, 0.0)
    q3 = (c + pltpu.roll(c, shift=1, axis=1)) + pltpu.roll(c, shift=2, axis=1)
    # per-lane grade quadratic form, already "repeat_interleave"d back onto blade lanes
    q = jnp.where(is_scalar, x2, q3)

    # smooth norm exactly as CEGNN: (q^2 + 1e-16)^(1/4)
    n = jnp.sqrt(jnp.sqrt(q * q + SMOOTH_EPS))
    denom = w * n + b                            # = sigmoid(a)*(n-1) + 1 + EPS
    approx = o_ref.dtype == jnp.bfloat16         # exact reciprocal for f32 outputs
    inv = pl.reciprocal(denom, approx=approx)
    o_ref[...] = (x * inv).astype(o_ref.dtype)


def _lane_tile(C):
    for t in (2048, 1024, 512, 256, 128):
        if C % t == 0:
            return t
    if C <= 2048:
        return C            # full extent: always a legal block shape
    return 1024             # partial boundary lane tiles (selects never read padding)


def _norm_call(x2d, gate, B, C, tr, tc, out_dtype, buffered):
    x_map = lambda j, i: (i, j)      # lane tiles outer, row tiles inner
    g_map = lambda j, i: (0, j)      # constant across the inner loop -> fetched once per lane tile
    if buffered:
        x_spec = pl.BlockSpec((tr, tc), x_map, pipeline_mode=pl.Buffered(3))
    else:
        x_spec = pl.BlockSpec((tr, tc), x_map)
    return pl.pallas_call(
        _norm_kernel,
        out_shape=jax.ShapeDtypeStruct((B, C), out_dtype),
        grid=(pl.cdiv(C, tc), pl.cdiv(B, tr)),
        in_specs=[
            x_spec,
            pl.BlockSpec((2, tc), g_map),
        ],
        out_specs=pl.BlockSpec((tr, tc), x_map),
        compiler_params=pltpu.CompilerParams(
            dimension_semantics=("parallel", "parallel"),
            vmem_limit_bytes=48 * 1024 * 1024,   # stays inside v7x's 64 MiB physical VMEM
        ),
    )(x2d, gate)


def normalization_layer(x, a):
    """Pallas forward.  x: (B, F, 8) multivectors, a: (F, 4) gate parameter."""
    B, F, D = x.shape
    assert D == DIM and a.shape == (F, N_SUBSPACES)
    C = F * D

    # Parameter-sized preprocessing hoisted out of the kernel:
    #   w = repeat_interleave(sigmoid(a)),  denom = w*n + b with b = 1 + EPS - w
    s_a = jax.nn.sigmoid(a.astype(jnp.float32))
    w = jnp.repeat(s_a, jnp.array(SUBSPACES), axis=-1, total_repeat_length=D)  # (F, 8)
    w = w.reshape(1, C)
    gate = jnp.concatenate([w, (1.0 + EPS) - w], axis=0)        # (2, C) fused gate

    x2d = x.reshape(B, C)        # free reshape: lane-dense layout, no data movement

    tc = _lane_tile(C)
    assert tc % 8 == 0, "lane tiles must be 8-aligned so grade masks (lane & 7) hold"

    # ~4 MiB of f32 per x/out block (1M elements); amortizes per-grid-step overhead.
    tr_max = max(8, ((1024 * 1024) // tc) // 8 * 8)
    tr = B if B <= tr_max else tr_max

    # v7x has 2 TensorCores: make sure there are >= 2 grid blocks when possible.
    if pl.cdiv(C, tc) * pl.cdiv(B, tr) < 2 and B >= 16:
        tr = max(8, (B // 2) // 8 * 8)

    try:
        out2d = _norm_call(x2d, gate, B, C, tr, tc, x.dtype,
                           buffered=hasattr(pl, "Buffered"))
    except Exception:
        # pipeline_mode / pl.Buffered unsupported on this JAX build: default 2-deep pipeline
        out2d = _norm_call(x2d, gate, B, C, tr, tc, x.dtype, buffered=False)
    return out2d.reshape(B, F, D)


def normalization_layer_ref(x, a):
    """Pure-JAX reference mirroring the PyTorch module."""
    x = x.astype(jnp.float32)
    x2 = x * x
    qs, idx = [], 0
    for s in SUBSPACES:
        qs.append(jnp.sum(x2[..., idx:idx + s], axis=-1, keepdims=True))
        idx += s
    q = jnp.concatenate(qs, axis=-1)                       # (B, F, NG)
    n = (q * q + SMOOTH_EPS) ** 0.25
    n = jax.nn.sigmoid(a) * (n - 1.0) + 1.0
    n_full = jnp.repeat(n, jnp.array(SUBSPACES), axis=-1,
                        total_repeat_length=DIM)           # (B, F, D)
    return x / (n_full + EPS)


if __name__ == "__main__":
    key = jax.random.PRNGKey(0)
    kx, ka, kx2 = jax.random.split(key, 3)

    B, F = 64, 16                                  # batch=64, features=16, blades=8

    # nn.Parameter(zeros(F, n_subspaces) + init), plus a small perturbation so the
    # per-feature / per-grade gate path is actually exercised.
    init = 0.0
    a = jnp.zeros((F, N_SUBSPACES), dtype=jnp.float32) + init
    a = a + 0.25 * jax.random.normal(ka, (F, N_SUBSPACES), dtype=jnp.float32)

    # 1) main f32 case (grid split into >=2 row tiles so both v7x cores get work)
    x = jax.random.normal(kx, (B, F, DIM), dtype=jnp.float32)
    out = jax.block_until_ready(normalization_layer(x, a))
    ref = normalization_layer_ref(x, a)
    assert out.shape == x.shape and out.dtype == x.dtype
    assert jnp.allclose(out, ref, atol=1e-5, rtol=1e-5), "mismatch vs reference (f32)"

    # 2) non-divisible batch: partial boundary row tiles on real hardware
    xb = jax.random.normal(kx2, (50, F, DIM), dtype=jnp.float32)
    outb = jax.block_until_ready(normalization_layer(xb, a))
    refb = normalization_layer_ref(xb, a)
    assert jnp.allclose(outb, refb, atol=1e-5, rtol=1e-5), "mismatch vs reference (partial tiles)"

    # 3) bf16 I/O path (halves HBM bytes; kernel computes in f32, approx reciprocal)
    xh = x.astype(jnp.bfloat16)
    outh = jax.block_until_ready(normalization_layer(xh, a))
    refh = normalization_layer_ref(xh.astype(jnp.float32), a)
    assert outh.dtype == jnp.bfloat16
    assert jnp.allclose(outh.astype(jnp.float32), refh, atol=5e-2, rtol=5e-2), \
        "mismatch vs reference (bf16)"

    print("KERNEL_OK")
</pallas_src>

<mosaic_0001>
module attributes {stable_mosaic.version = 11 : i64} {
  func.func @_norm_kernel(%arg0: i32, %arg1: i32, %arg2: memref<32x128xf32, #tpu.memory_space<vmem>>, %arg3: memref<2x128xf32, #tpu.memory_space<vmem>>, %arg4: memref<32x128xf32, #tpu.memory_space<vmem>>) attributes {dimension_semantics = [#tpu.dimension_semantics<parallel>, #tpu.dimension_semantics<parallel>], iteration_bounds = array<i64: 1, 2>, scalar_prefetch = 0 : i64, scratch_operands = 0 : i64, tpu.core_type = #tpu.core_type<tc>, window_params = [{transform_indices = @transform_0, window_bounds = array<i64: 32, 128>}, {transform_indices = @transform_1, window_bounds = array<i64: 2, 128>}, {transform_indices = @transform_2, window_bounds = array<i64: 32, 128>}]} {
    %c0 = arith.constant 0 : index
    %c0_0 = arith.constant 0 : index
    %0 = vector.load %arg2[%c0, %c0_0] : memref<32x128xf32, #tpu.memory_space<vmem>>, vector<32x128xf32>
    %c0_1 = arith.constant 0 : index
    %c0_2 = arith.constant 0 : index
    %1 = vector.load %arg3[%c0_1, %c0_2] : memref<2x128xf32, #tpu.memory_space<vmem>>, vector<2x128xf32>
    %2 = vector.extract_strided_slice %1 {offsets = [0, 0], sizes = [1, 128], strides = [1, 1]} : vector<2x128xf32> to vector<1x128xf32>
    %3 = vector.extract_strided_slice %1 {offsets = [1, 0], sizes = [1, 128], strides = [1, 1]} : vector<2x128xf32> to vector<1x128xf32>
    %4 = tpu.iota {dimensions = array<i32: 1>} : vector<1x128xi32>
    %c7_i32 = arith.constant 7 : i32
    %5 = vector.broadcast %c7_i32 : i32 to vector<1x128xi32>
    %6 = arith.andi %4, %5 : vector<1x128xi32>
    %c0_i32 = arith.constant 0 : i32
    %7 = vector.broadcast %c0_i32 : i32 to vector<1x128xi32>
    %8 = arith.cmpi eq, %6, %7 : vector<1x128xi32>
    %c7_i32_3 = arith.constant 7 : i32
    %9 = vector.broadcast %c7_i32_3 : i32 to vector<1x128xi32>
    %10 = arith.cmpi eq, %6, %9 : vector<1x128xi32>
    %11 = arith.ori %8, %10 : vector<1x128xi1>
    %c1_i32 = arith.constant 1 : i32
    %12 = vector.broadcast %c1_i32 : i32 to vector<1x128xi32>
    %13 = arith.cmpi eq, %6, %12 : vector<1x128xi32>
    %c4_i32 = arith.constant 4 : i32
    %14 = vector.broadcast %c4_i32 : i32 to vector<1x128xi32>
    %15 = arith.cmpi eq, %6, %14 : vector<1x128xi32>
    %16 = arith.ori %13, %15 : vector<1x128xi1>
    %17 = arith.mulf %0, %0 : vector<32x128xf32>
    %c127_i32 = arith.constant 127 : i32
    %18 = tpu.dynamic_rotate %17 by %c127_i32 dim 1 : vector<32x128xf32>, i32 -> vector<32x128xf32>
    %19 = arith.addf %17, %18 : vector<32x128xf32>
    %c126_i32 = arith.constant 126 : i32
    %20 = tpu.dynamic_rotate %17 by %c126_i32 dim 1 : vector<32x128xf32>, i32 -> vector<32x128xf32>
    %21 = arith.addf %19, %20 : vector<32x128xf32>
    %cst = arith.constant 0.000000e+00 : f32
    %22 = vector.shape_cast %16 : vector<1x128xi1> to vector<1x128xi1>
    %23 = vector.broadcast %22 : vector<1x128xi1> to vector<32x128xi1>
    %24 = vector.broadcast %cst : f32 to vector<32x128xf32>
    %25 = arith.select %23, %21, %24 : vector<32x128xi1>, vector<32x128xf32>
    %c1_i32_4 = arith.constant 1 : i32
    %26 = tpu.dynamic_rotate %25 by %c1_i32_4 dim 1 : vector<32x128xf32>, i32 -> vector<32x128xf32>
    %27 = arith.addf %25, %26 : vector<32x128xf32>
    %c2_i32 = arith.constant 2 : i32
    %28 = tpu.dynamic_rotate %25 by %c2_i32 dim 1 : vector<32x128xf32>, i32 -> vector<32x128xf32>
    %29 = arith.addf %27, %28 : vector<32x128xf32>
    %30 = vector.shape_cast %11 : vector<1x128xi1> to vector<1x128xi1>
    %31 = vector.broadcast %30 : vector<1x128xi1> to vector<32x128xi1>
    %32 = arith.select %31, %17, %29 : vector<32x128xi1>, vector<32x128xf32>
    %33 = arith.mulf %32, %32 : vector<32x128xf32>
    %cst_5 = arith.constant 1.000000e-16 : f32
    %34 = vector.broadcast %cst_5 : f32 to vector<32x128xf32>
    %35 = arith.addf %33, %34 : vector<32x128xf32>
    %36 = math.sqrt %35 : vector<32x128xf32>
    %37 = math.sqrt %36 : vector<32x128xf32>
    %38 = vector.broadcast %2 : vector<1x128xf32> to vector<32x128xf32>
    %39 = arith.mulf %38, %37 : vector<32x128xf32>
    %40 = vector.broadcast %3 : vector<1x128xf32> to vector<32x128xf32>
    %41 = arith.addf %39, %40 : vector<32x128xf32>
    %42 = tpu.reciprocal %41 : vector<32x128xf32> -> vector<32x128xf32>
    %43 = arith.mulf %0, %42 : vector<32x128xf32>
    %c0_6 = arith.constant 0 : index
    %c0_7 = arith.constant 0 : index
    %44 = vector.load %arg4[%c0_6, %c0_7] : memref<32x128xf32, #tpu.memory_space<vmem>>, vector<32x128xf32>
    tpu.vector_store %arg4[%c0_6, %c0_7], %43 {strides = array<i32>} : memref<32x128xf32, #tpu.memory_space<vmem>>, vector<32x128xf32>,
    return
  }
  func.func @transform_0(%arg0: i32, %arg1: i32) -> (i32, i32) {
    %c0_i32 = arith.constant 0 : i32
    return %arg1, %arg0 : i32, i32
  }
  func.func @transform_1(%arg0: i32, %arg1: i32) -> (i32, i32) {
    %c0_i32 = arith.constant 0 : i32
    %c0_i32_0 = arith.constant 0 : i32
    return %c0_i32, %arg0 : i32, i32
  }
  func.func @transform_2(%arg0: i32, %arg1: i32) -> (i32, i32) {
    %c0_i32 = arith.constant 0 : i32
    return %arg1, %arg0 : i32, i32
  }
}

</mosaic_0001>

<bundles_post_ra>
// kernel: tpu_custom_call.1
= control target key start
LH: loop header
LB: loop body
LE: loop exit
PB: predicated region body
PF: predicated region fallthrough
CT: control target
= control target key end

     0   :  { %7 = vsyncpa [#allocation3], 0  ;;  %s968_s0 = inlined_call_operand.hbm [shape: f32[64,128], index: 0, kind: input, shape index: {}]   ;;  %s969_s1 = inlined_call_operand.vmem [shape: f32[2,128], index: 1, kind: input, shape index: {}]   ;;  %s970_s2 = inlined_call_operand.hbm [shape: f32[64,128], index: 2, kind: output, shape index: {}]  }
   0x1   :  { %9 = vsyncpa [#allocation3 + $0x1], 0 }
   0x2   :  { %10 = vsyncpa [#allocation4], 0 }
   0x3   :  { %12 = vsyncpa [#allocation4 + $0x1], 0  ;;  %s734_s9 = smov 0   ;;  %s736_s10 = smov 0  }
   0x4   :  { %s738_s11 = smov 0   ;;  %s740_s12 = smov 0  }
   0x5   :  { %s742_s13 = smov 0   ;;  %s744_s14 = smov 0  }
   0x6 LB: > { %s483_s15 = sadd.s32 4294967295, %s707_s14   ;;  %s484_s16 = sadd.s32 4294967294, %s707_s14   ;;  %s707_s14 = sphi %s744_s14, %s18_s14   ;;  %s703_s13 = sphi %s742_s13, %s987_s13   ;;  %s699_s12 = sphi %s740_s12, %s986_s12   ;;  %s695_s11 = sphi %s738_s11, %s985_s11   ;;  %s691_s10 = sphi %s736_s10, %s984_s10   ;;  %s687_s9 = sphi %s734_s9, %s983_s9  }
   0x7   : > { %s27_s17 = sadd.s32 1, %s703_s13  ;;  %s39_s18 = sadd.s32 1, %s695_s11 }
   0x8   : > { %p28_p0 = scmp.ge.s32.totalorder %s27_s17, 2  ;;  %p46_p1 = scmp.ne.s32.totalorder %s695_s11, %s691_s10 }
   0x9   : > { %p47_p2 = scmp.eq.s32.totalorder %s707_s14, 0  ;;  %p52_p3 = scmp.ne.s32.totalorder %s691_s10, %s687_s9 }
   0xa   : > { %s989_s17 = smov (%p28_p0, %s27_s17), 0  ;;  %p53_p5 = scmp.eq.s32.totalorder %s483_s15, 0 }
   0xb   : > { %p775_p4 = por %p47_p2, %p46_p1  ;;  %s34_s20 = ssub.s32 %s703_s13, %s989_s17 }
   0xc   : > { %p104_p6 = scmp.eq.s32.totalorder %s483_s15, 1  ;;  %p37_p7 = scmp.eq.s32.totalorder %s34_s20, 0 }
   0xd   : > { %p781_p8 = por %p53_p5, %p52_p3  ;;  %p110_p10 = scmp.eq.s32.totalorder %s484_s16, 1 }
   0xe   : > { %p785_p9 = por %p104_p6, %p46_p1  ;;  %p513_p13 = scmp.lt.s32.totalorder %s707_s14, 2 }
   0xf   : > { %s790_s23 = scalar_select %p37_p7, %s695_s11, %s39_s18  }
  0x10   : > { %s974_s22 = scalar_select %p785_p9, 1, 0 }
  0x11   : > { %p792_p11 = por %p110_p10, %p52_p3  ;;  %s137_s25 = sand.u32 1, %s695_s11  }
  0x12   : > { %s488_s26 = sshll.u32 %s137_s25, 5  ;;  %s499_s27 = sshll.u32 %s703_s13, 9 }
  0x13   : > { %s975_s24 = scalar_select %p792_p11, 1, 0 }
  0x14   : > { %s803_s30 = scalar_lea.hbm %s968_s0, %s499_s27  ;;  %s141_s3 = scalar_lea.vmem [#allocation2], %s488_s26 }
  0x15   : > { %s149_s4 = sshll.u32 %s141_s3, 4  ;;  %p809_p0 = pnand %p513_p13, %p775_p4  ;;  %s805_s4 = int_to_ptr.vmem [resolvable:$true] %s149_s4 }
  0x16   : > { %s814_s6 = scalar_lea.sflag [#allocation3], %s137_s25  ;;  %s595_s7 = scalar_lea.hbm %s803_s30, 512 }
  0x17   : > { %p596_p2 = scmp.ne.s32.totalorder %s803_s30, %s595_s7  ;;  %p597_p3 = pneg %p809_p0 }
  0x18   : > { %s600_s16 = scalar_lea.hbm %s968_s0, 1024  ;;  %p601_p4 = scmp.lt.u32.totalorder %s803_s30, %s968_s0 }
  0x19   : > { %p598_p5 = pnand %p597_p3, %p596_p2  ;;  %p602_p7 = scmp.lt.u32.totalorder %s600_s16, %s595_s7 }
  0x1a   : > { %p604_p13 = scmp.lt.u32.totalorder %s595_s7, %s803_s30 }
  0x1b   : > { %p599_p6 = pneg %p598_p5  ;;  %p603_p10 = por %p602_p7, %p601_p4 }
  0x1d   : > { %p605_p12 = por %p604_p13, %p603_p10 }
  0x1f   : > { %p606_p1 = pnand %p605_p12, %p599_p6 }
  0x21   : > { %609 = shalt.err (!%p606_p1)
}
  0x22   : > { %s610_s20 = scalar_lea.vmem %s805_s4, 512  ;;  %s709_s25 = smov [#allocation2]  }
  0x23   : > { %p611_p2 = scmp.ne.s32.totalorder %s805_s4, %s610_s20  ;;  %s615_s26 = sshll.u32 %s709_s25, 4  ;;  %s616_s26 = int_to_ptr.vmem [resolvable:$false] %s615_s26 }
  0x24   : > { %s617_s27 = scalar_lea.vmem %s616_s26, 1024  ;;  %p618_p9 = scmp.lt.s32.totalorder %s805_s4, %s616_s26 }
  0x25   : > { %p613_p5 = pnand %p611_p2, %p597_p3  ;;  %p619_p4 = scmp.lt.s32.totalorder %s617_s27, %s610_s20 }
  0x27   : > { %p614_p11 = pneg %p613_p5  ;;  %p620_p7 = por %p619_p4, %p618_p9 }
  0x29   : > { %p621_p10 = pnand %p620_p7, %p614_p11 }
  0x2b   : > { %624 = shalt.err (!%p621_p10)
}
  0x2c   : > { %s710_s28 = smov 128   ;;  %s711_s29 = smov 8  }
  0x2d   : > { %508 = dma.hbm_to_vmem [thread:$0]  (!%p809_p0), %s803_s30, 512, %s805_s4, %s814_s6, %s710_s28, %s710_s28, %s711_s29  }
  0x2e   : > { %p157_p12 = scmp.lt.s32.totalorder %s707_s14, 3  ;;  %p977_p1 = scmp.ge.s32.totalorder %s707_s14, 1 }
  0x30   : > { %p158_p3 = pnand %p977_p1, %p157_p12 }
  0x31   : > { %s846_s3 = sand.u32 (!%p158_p3), 1, %s691_s10  }
  0x32   : > { %161 = sbr.rel (%p158_p3) target bundleno = 384 (0x180), region = 28  ;;  %s492_s7 = sshll.u32 (!%p158_p3), %s846_s3, 5 }
  0x33   : > { %s164_s8 = scalar_lea.sflag (!%p158_p3), [#allocation3], %s846_s3  ;;  %s167_s15 = scalar_lea.vmem (!%p158_p3), [#allocation2], %s492_s7 }
  0x39   : > { %678 = dma.done.wait (%p781_p8), %s164_s8, 512  }
  0x3a   : > { %680 = vsyncadd (%p781_p8), %s164_s8, 4294966784  ;;  %v856_v0 = vld [vmem:[%s167_s15 + $0x10] sm:$0xff]  ;;  %v858_v1 = vld [vmem:[%s167_s15] sm:$0xff]  ;;  %s712_s30 = smov 127   ;;  %s713_s21 = smov 126   ;;  %v203_v8 = vlaneseq }
  0x3b   : > { %v860_v2 = vld [vmem:[%s167_s15 + $0x18] sm:$0xff]  ;;  %v864_v3 = vmul.f32 %v856_v0, %v856_v0  ;;  %v868_v4 = vmul.f32 %v858_v1, %v858_v1  ;;  %v870_v5 = vld [vmem:[%s167_s15 + $0x8] sm:$0xff]  ;;  %s714_s4 = smov 1   ;;  %s715_s5 = smov 2  }
  0x3c   : > { %v876_v6 = vmul.f32 %v860_v2, %v860_v2  ;;  %v213_v7 = vmul.f32 %v870_v5, %v870_v5  ;;  %v204_v9 = vand.u32 127, %v203_v8  ;;  %s191_s18 = scalar_lea.vmem [#allocation5], %s492_s7  ;;  %s500_s19 = sshll.u32 %s699_s12, 9 }
  0x3d   : > { %220 = vrot.lane.b32.xlu1 %v864_v3, %s712_s30  ;;  %216 = vrot.lane.b32.xlu0 %v868_v4, %s712_s30  ;;  %s383_s20 = sshll.u32 %s191_s18, 4  ;;  %s916_s27 = scalar_lea.hbm %s970_s2, %s500_s19  ;;  %s918_s20 = int_to_ptr.vmem [resolvable:$true] %s383_s20 }
  0x3e   : > { %v205_v12 = vand.u32 7, %v204_v9  ;;  %s369_s12 = scalar_lea.sflag [#allocation4], %s846_s3  ;;  %s625_s28 = scalar_lea.vmem %s918_s20, 512 }
  0x3f   : > { %p626_p8 = scmp.ne.s32.totalorder %s918_s20, %s625_s28  ;;  %p980_p9 = scmp.ne.s32.totalorder %s974_s22, 0 }
  0x40   : > { %vm209_vm0 = vcmp.eq.s32.totalorder %v205_v12, 1  ;;  %vm210_vm1 = vcmp.eq.s32.totalorder %v205_v12, 4  ;;  %vm206_vm3 = vcmp.eq.s32.totalorder %v205_v12, 0  ;;  %vm207_vm4 = vcmp.eq.s32.totalorder %v205_v12, 7  ;;  %s716_s29 = smov [#allocation5]  }
  0x41   : > { %222 = vrot.lane.b32.xlu1 %v876_v6, %s712_s30  ;;  %218 = vrot.lane.b32.xlu0 %v213_v7, %s712_s30  ;;  %vm211_vm2 = vmor %vm209_vm0, %vm210_vm1  ;;  %p627_p11 = pnand %p626_p8, %p980_p9  ;;  %s629_s7 = sshll.u32 %s716_s29, 4  ;;  %s630_s7 = int_to_ptr.vmem [resolvable:$false] %s629_s7 }
  0x42   : > { %vm888_vm5 = vmor %vm206_vm3, %vm207_vm4  ;;  %s631_s8 = scalar_lea.vmem %s630_s7, 1024  ;;  %p632_p6 = scmp.lt.s32.totalorder %s918_s20, %s630_s7 }
  0x43   : > { %p628_p0 = pneg %p627_p11  ;;  %p633_p13 = scmp.lt.s32.totalorder %s631_s8, %s625_s28 }
  0x45   : > { %230 = vrot.lane.b32.xlu1 %v213_v7, %s713_s21  ;;  %228 = vrot.lane.b32.xlu0 %v868_v4, %s713_s21  ;;  %p634_p2 = por %p633_p13, %p632_p6 }
  0x47   : > { %p635_p5 = pnand %p634_p2, %p628_p0 }
  0x49   : > { %234 = vrot.lane.b32.xlu1 %v876_v6, %s713_s21  ;;  %232 = vrot.lane.b32.xlu0 %v864_v3, %s713_s21 }
  0xaf   : > { %v221_v10 = vpop.permute.xlu1 %220  ;;  %v217_v11 = vpop.permute.xlu0 %216 }
  0xb0   : > { %v224_v15 = vadd.f32 %v217_v11, %v868_v4  ;;  %v226_v21 = vadd.f32 %v221_v10, %v864_v3 }
  0xb3   : > { %v223_v13 = vpop.permute.xlu1 %222  ;;  %v219_v14 = vpop.permute.xlu0 %218 }
  0xb4   : > { %v225_v16 = vadd.f32 %v219_v14, %v213_v7  ;;  %v227_v22 = vadd.f32 %v223_v13, %v876_v6  ;;  %v341_v13 = vshrl.u32 %v203_v8, 7 }
  0xb6   : > { %v350_v8 = vsub.s32 1, %v341_v13 }
  0xb7   : > { %v231_v17 = vpop.permute.xlu1 %230  ;;  %v229_v18 = vpop.permute.xlu0 %228 }
  0xb8   : > { %v237_v19 = vadd.f32 %v231_v17, %v225_v16  ;;  %v236_v20 = vadd.f32 %v229_v18, %v224_v15 }
  0xba   : > { %v243_v23 = vsel %vm211_vm2, %v237_v19, 0.0  ;;  %v242_v24 = vsel %vm211_vm2, %v236_v20, 0.0 }
  0xbb   : > { %v235_v25 = vpop.permute.xlu1 %234  ;;  %248 = vrot.lane.b32.xlu1 %v243_v23, %s714_s4  ;;  %246 = vrot.lane.b32.xlu0 %v242_v24, %s714_s4  ;;  %v233_v26 = vpop.permute.xlu0 %232 }
  0xbc   : > { %v239_v27 = vadd.f32 %v235_v25, %v227_v22  ;;  %v238_v28 = vadd.f32 %v233_v26, %v226_v21  ;;  %v342_v22 = vsub.s32 0, %v341_v13 }
  0xbe   : > { %v245_v29 = vsel %vm211_vm2, %v239_v27, 0.0  ;;  %v244_v30 = vsel %vm211_vm2, %v238_v28, 0.0 }
  0xbf   : > { %252 = vrot.lane.b32.xlu1 %v245_v29, %s714_s4  ;;  %250 = vrot.lane.b32.xlu0 %v244_v30, %s714_s4 }
  0xc3   : > { %260 = vrot.lane.b32.xlu1 %v243_v23, %s715_s5  ;;  %258 = vrot.lane.b32.xlu0 %v242_v24, %s715_s5 }
  0xc7   : > { %264 = vrot.lane.b32.xlu1 %v245_v29, %s715_s5  ;;  %262 = vrot.lane.b32.xlu0 %v244_v30, %s715_s5 }
 0x12d   : > { %v249_v31 = vpop.permute.xlu1 %248  ;;  %v247_v32 = vpop.permute.xlu0 %246 }
 0x12e   : > { %v255_v35 = vadd.f32 %v249_v31, %v243_v23  ;;  %v254_v36 = vadd.f32 %v247_v32, %v242_v24  ;;  %v202_v23 = vld [vmem:[%s969_s1] sm:$0x3] }
 0x12f   : > { %v343_v25 = vrot.slane %v202_v23, %v342_v22 }
 0x131   : > { %v253_v33 = vpop.permute.xlu1 %252  ;;  %v251_v34 = vpop.permute.xlu0 %250 }
 0x132   : > { %v257_v42 = vadd.f32 %v253_v33, %v245_v29  ;;  %v256_v43 = vadd.f32 %v251_v34, %v244_v30  ;;  %v351_v29 = vrot.slane %v202_v23, %v350_v8 }
 0x135   : > { %v261_v38 = vpop.permute.xlu1 %260  ;;  %v259_v39 = vpop.permute.xlu0 %258 }
 0x136   : > { %v267_v40 = vadd.f32 %v261_v38, %v255_v35  ;;  %v266_v41 = vadd.f32 %v259_v39, %v254_v36 }
 0x138   : > { %v273_v44 = vsel %vm888_vm5, %v213_v7, %v267_v40  ;;  %v272_v45 = vsel %vm888_vm5, %v868_v4, %v266_v41 }
 0x139   : > { %v277_v46 = vmul.f32 %v273_v44, %v273_v44  ;;  %v276_v47 = vmul.f32 %v272_v45, %v272_v45  ;;  %v265_v48 = vpop.permute.xlu1 %264  ;;  %v263_v49 = vpop.permute.xlu0 %262 }
 0x13a   : > { %v269_v50 = vadd.f32 %v265_v48, %v257_v42  ;;  %v268_v51 = vadd.f32 %v263_v49, %v256_v43 }
 0x13b   : > { %v281_v52 = vadd.f32 1e-16, %v277_v46  ;;  %v280_v53 = vadd.f32 1e-16, %v276_v47 }
 0x13c   : > { %v275_v54 = vsel %vm888_vm5, %v876_v6, %v269_v50  ;;  %v274_v55 = vsel %vm888_vm5, %v864_v3, %v268_v51 }
 0x13d   : > { %571 = vrsqrt.f32 %v281_v52  ;;  %v279_v56 = vmul.f32 %v275_v54, %v275_v54  ;;  %v278_v57 = vmul.f32 %v274_v55, %v274_v55  ;;  %vm293_vm6 = vcmp.eq.f32.partialorder %v281_v52, inf }
 0x13e   : > { %573 = vrsqrt.f32 %v280_v53  ;;  %v296_v63 = vand.u32 2147483648, %v281_v52  ;;  %vm295_vm7 = vcmp.eq.f32.partialorder %v281_v52, 0.0  ;;  %vm286_vm8 = vcmp.eq.f32.partialorder %v280_v53, inf }
 0x13f   : > { %v283_v58 = vadd.f32 1e-16, %v279_v56  ;;  %v282_v59 = vadd.f32 1e-16, %v278_v57  ;;  %v289_v3 = vand.u32 2147483648, %v280_v53  ;;  %vm288_vm9 = vcmp.eq.f32.partialorder %v280_v53, 0.0 }
 0x141   : > { %575 = vrsqrt.f32 %v283_v58  ;;  %vm307_vm10 = vcmp.eq.f32.partialorder %v283_v58, inf  ;;  %v310_v16 = vand.u32 2147483648, %v283_v58  ;;  %vm300_vm11 = vcmp.eq.f32.partialorder %v282_v59, inf }
 0x142   : > { %577 = vrsqrt.f32 %v282_v59  ;;  %v303_v17 = vand.u32 2147483648, %v282_v59  ;;  %vm309_vm12 = vcmp.eq.f32.partialorder %v283_v58, 0.0  ;;  %vm302_vm13 = vcmp.eq.f32.partialorder %v282_v59, 0.0 }
 0x147   : > { %v572_v60 = vpop.eup %571 }
 0x148   : > { %v574_v61 = vpop.eup %573  ;;  %v292_v62 = vmul.f32 %v572_v60, %v281_v52 }
 0x149   : > { %v285_v4 = vmul.f32 %v574_v61, %v280_v53 }
 0x14a   : > { %v294_v7 = vsel %vm293_vm6, %v281_v52, %v292_v62 }
 0x14b   : > { %v297_v6 = vsel %vm295_vm7, %v296_v63, %v294_v7  ;;  %v287_v9 = vsel %vm286_vm8, %v280_v53, %v285_v4  ;;  %v576_v10 = vpop.eup %575 }
 0x14c   : > { %579 = vrsqrt.f32 %v297_v6  ;;  %v290_v11 = vsel %vm288_vm9, %v289_v3, %v287_v9  ;;  %v578_v12 = vpop.eup %577  ;;  %v306_v14 = vmul.f32 %v576_v10, %v283_v58  ;;  %vm321_vm14 = vcmp.eq.f32.partialorder %v297_v6, inf }
 0x14d   : > { %581 = vrsqrt.f32 %v290_v11  ;;  %v299_v15 = vmul.f32 %v578_v12, %v282_v59  ;;  %v324_v28 = vand.u32 2147483648, %v297_v6  ;;  %vm323_vm15 = vcmp.eq.f32.partialorder %v297_v6, 0.0 }
 0x14e   : > { %v308_v18 = vsel %vm307_vm10, %v283_v58, %v306_v14  ;;  %vm314_vm0 = vcmp.eq.f32.partialorder %v290_v11, inf  ;;  %v317_v33 = vand.u32 2147483648, %v290_v11  ;;  %vm316_vm1 = vcmp.eq.f32.partialorder %v290_v11, 0.0 }
 0x14f   : > { %v301_v19 = vsel %vm300_vm11, %v282_v59, %v299_v15  ;;  %v311_v20 = vsel %vm309_vm12, %v310_v16, %v308_v18 }
 0x150   : > { %v304_v21 = vsel %vm302_vm13, %v303_v17, %v301_v19  ;;  %583 = vrsqrt.f32 %v311_v20  ;;  %vm335_vm2 = vcmp.eq.f32.partialorder %v311_v20, inf  ;;  %v338_v43 = vand.u32 2147483648, %v311_v20 }
 0x151   : > { %585 = vrsqrt.f32 %v304_v21  ;;  %vm337_vm3 = vcmp.eq.f32.partialorder %v311_v20, 0.0  ;;  %vm328_vm4 = vcmp.eq.f32.partialorder %v304_v21, inf  ;;  %v331_v46 = vand.u32 2147483648, %v304_v21 }
 0x152   : > { %vm330_vm5 = vcmp.eq.f32.partialorder %v304_v21, 0.0 }
 0x156   : > { %v580_v24 = vpop.eup %579 }
 0x157   : > { %v320_v26 = vmul.f32 %v580_v24, %v297_v6  ;;  %v582_v27 = vpop.eup %581 }
 0x158   : > { %v313_v31 = vmul.f32 %v582_v27, %v290_v11 }
 0x159   : > { %v322_v30 = vsel %vm321_vm14, %v297_v6, %v320_v26 }
 0x15a   : > { %v325_v32 = vsel %vm323_vm15, %v324_v28, %v322_v30  ;;  %v315_v35 = vsel %vm314_vm0, %v290_v11, %v313_v31  ;;  %v584_v37 = vpop.eup %583 }
 0x15b   : > { %v345_v34 = vmul.f32 %v343_v25, %v325_v32  ;;  %v318_v36 = vsel %vm316_vm1, %v317_v33, %v315_v35  ;;  %v586_v40 = vpop.eup %585  ;;  %v334_v41 = vmul.f32 %v584_v37, %v311_v20 }
 0x15c   : > { %v344_v39 = vmul.f32 %v343_v25, %v318_v36  ;;  %v327_v44 = vmul.f32 %v586_v40, %v304_v21 }
 0x15d   : > { %v353_v38 = vadd.f32 %v351_v29, %v345_v34  ;;  %v336_v45 = vsel %vm335_vm2, %v311_v20, %v334_v41 }
 0x15e   : > { %v352_v42 = vadd.f32 %v351_v29, %v344_v39  ;;  %v339_v47 = vsel %vm337_vm3, %v338_v43, %v336_v45  ;;  %v329_v48 = vsel %vm328_vm4, %v304_v21, %v327_v44 }
 0x15f   : > { %587 = vrcp.f32 %v353_v38  ;;  %v347_v49 = vmul.f32 %v343_v25, %v339_v47  ;;  %v332_v50 = vsel %vm330_vm5, %v331_v46, %v329_v48 }
 0x160   : > { %589 = vrcp.f32 %v352_v42  ;;  %v346_v51 = vmul.f32 %v343_v25, %v332_v50 }
 0x161   : > { %v355_v52 = vadd.f32 %v351_v29, %v347_v49 }
 0x162   : > { %v354_v53 = vadd.f32 %v351_v29, %v346_v51 }
 0x163   : > { %591 = vrcp.f32 %v355_v52 }
 0x164   : > { %593 = vrcp.f32 %v354_v53 }
 0x169   : > { %v588_v54 = vpop.eup %587 }
 0x16a   : > { %v361_v55 = vmul.f32 %v588_v54, %v870_v5  ;;  %v590_v56 = vpop.eup %589 }
 0x16b   : > { %v360_v57 = vmul.f32 %v590_v56, %v858_v1 }
 0x16c   : > { %365 = vst [vmem:[%s191_s18 + $0x8] sm:$0xff] %v361_v55 }
 0x16d   : > { %364 = vst [vmem:[%s191_s18] sm:$0xff] %v360_v57  ;;  %v592_v58 = vpop.eup %591 }
 0x16e   : > { %v594_v59 = vpop.eup %593  ;;  %v363_v60 = vmul.f32 %v592_v58, %v860_v2 }
 0x16f   : > { %v362_v1 = vmul.f32 %v594_v59, %v856_v0 }
 0x170   : > { %367 = vst [vmem:[%s191_s18 + $0x18] sm:$0xff] %v363_v60 }
 0x171   : > { %366 = vst [vmem:[%s191_s18 + $0x10] sm:$0xff] %v362_v1 }
 0x172   : > { %638 = shalt.err (!%p635_p5)
}
 0x173   : > { %s639_s15 = scalar_lea.hbm %s916_s27, 512  ;;  %s643_s4 = scalar_lea.hbm %s970_s2, 1024 }
 0x174   : > { %p640_p4 = scmp.ne.s32.totalorder %s916_s27, %s639_s15  ;;  %p644_p12 = scmp.lt.u32.totalorder %s916_s27, %s970_s2 }
 0x175   : > { %p645_p1 = scmp.lt.u32.totalorder %s643_s4, %s639_s15  ;;  %p647_p8 = scmp.lt.u32.totalorder %s639_s15, %s916_s27 }
 0x176   : > { %p641_p7 = pnand %p640_p4, %p980_p9 }
 0x177   : > { %p646_p3 = por %p645_p1, %p644_p12 }
 0x178   : > { %p642_p10 = pneg %p641_p7 }
 0x179   : > { %p648_p11 = por %p647_p8, %p646_p3 }
 0x17b   : > { %p649_p0 = pnand %p648_p11, %p642_p10 }
 0x17d   : > { %652 = shalt.err (!%p649_p0)
}
 0x17e   : > { %s717_s16 = smov 128   ;;  %s718_s18 = smov 8  }
 0x17f   : > { %503 = dma.vmem_to_hbm [thread:$0]  (%p980_p9), %s918_s20, 512, %s916_s27, %s369_s12, %s717_s16, %s717_s16, %s718_s18  }
 0x180 PF: > { %s398_s19 = sand.u32 1, %s687_s9   ;;  %p981_p6 = scmp.ne.s32.totalorder %s975_s24, 0 }
 0x181   : > { %p982_p13 = scmp.ge.s32.totalorder %s707_s14, 2  ;;  %s399_s25 = scalar_lea.sflag [#allocation4], %s398_s19 }
 0x183   : > { %p510_p2 = pnand %p982_p13, %p981_p6 }
 0x185   : > { %682 = dma.done.wait (!%p510_p2), %s399_s25, 512  }
 0x186   : > { %684 = vsyncadd (!%p510_p2), %s399_s25, 4294966784  ;;  %s18_s14 = sadd.s32 1, %s707_s14   ;;  %s983_s9 = smov %s691_s10 }
 0x187   : > { %p15_p5 = scmp.ge.s32.totalorder %s18_s14, 4   ;;  %s984_s10 = smov %s695_s11 }
 0x188   : > { %s985_s11 = smov %s790_s23  ;;  %s986_s12 = smov %s703_s13 }
 0x189   : > { %s987_s13 = smov %s989_s17  ;;  %17 = sbr.rel (!%p15_p5) target bundleno = 6 (0x6), region = 76 }
 0x190   :  { %404 = vsyncpa [#allocation3], 1 }
 0x191   :  { %406 = vsyncpa [#allocation3 + $0x1], 1 }
 0x192   :  { %407 = vsyncpa [#allocation4], 1 }
 0x193   :  { %409 = vsyncpa [#allocation4 + $0x1], 1 }

</bundles_post_ra>
